<compile_context>
chip_gen: v6e
topology: v6e:2x2x1
jax: 0.10.0
libtpu: 0.0.40
codegen_flags: <defaults>
</compile_context>

<pallas_src>
import functools
import math

import jax
import jax.numpy as jnp
from jax import lax
from jax.experimental import pallas as pl
from jax.experimental.pallas import tpu as pltpu


def _round_up(n, m):
    return ((n + m - 1) // m) * m


def simple_linear_kernel(x_ref, w1_ref, b1_ref, w2a_ref, w2b_ref, b2_ref, o_ref,
                         *, total_rows, steps_per_partial, sub_rows, n_sub):
    c = pl.program_id(0)          # partial / TensorCore axis ("parallel")
    i = pl.program_id(1)          # batch-tile reduction axis ("arbitrary")

    # Output block index depends only on c => block is resident across i.
    # Initialize once per partial and accumulate directly into it (no scratch).
    @pl.when(i == 0)
    def _():
        o_ref[...] = jnp.zeros_like(o_ref)

    tile_rows = x_ref.shape[0]
    # Unclamped global row offset of this tile.  (The BlockSpec clamps the
    # block index, so overhang tiles re-read a valid tile; the mask below
    # zeroes all of their rows.)
    tile_offset = (c * steps_per_partial + i) * tile_rows

    # Small grid-invariant operands: load into vregs once per grid step.
    w1 = w1_ref[...]
    b1 = b1_ref[...]
    w2a = w2a_ref[...]
    w2b = w2b_ref[...]
    b2 = b2_ref[...]

    def body(j, acc):
        start = pl.multiple_of(j * sub_rows, sub_rows)
        xc = x_ref[pl.ds(start, sub_rows), :]                          # (sub, IN)

        # Zero-mask rows with global index >= B (ragged last tile / overhang)
        # BEFORE any matmul, so garbage/NaN rows never reach the accumulator.
        row = tile_offset + start + lax.broadcasted_iota(jnp.int32, (sub_rows, 1), 0)
        xc = jnp.where(row < total_rows, xc, 0.0)

        # x1 = x @ W1 + b1 ; x2 = relu(x1)
        x1 = jnp.dot(xc, w1, preferred_element_type=jnp.float32) + b1
        x2 = jnp.maximum(x1, 0.0)

        # concat([x1, x2], 1) @ W2 + b2  ==  x1 @ W2[:OUT] + x2 @ W2[OUT:] + b2
        # (avoids materializing the lane concat)
        x3 = (jnp.dot(x1, w2a, preferred_element_type=jnp.float32)
              + jnp.dot(x2, w2b, preferred_element_type=jnp.float32)
              + b2)                                                    # (sub, 5)

        # acc += x_chunk.T @ x3_chunk  (contract over the batch/sublane dim;
        # masked rows contribute exactly zero).
        return acc + lax.dot_general(
            xc, x3,
            dimension_numbers=(((0,), (0,)), ((), ())),
            preferred_element_type=jnp.float32)                       # (IN, 5)

    acc = lax.fori_loop(0, n_sub, body, jnp.zeros(o_ref.shape, jnp.float32),
                        unroll=(n_sub <= 2))
    o_ref[...] += acc


def simple_linear_forward(x, w1, b1, w2, b2, *, batch_tile=16384, sub_tile=1024,
                          num_partials=None):
    B, in_features = x.shape
    out_features = w1.shape[1]
    assert w2.shape == (2 * out_features, 5)

    # ---- tile-size selection -------------------------------------------------
    # sub_rows: fixed in-kernel compute chunk (keeps intermediates tiny).
    tb_target = min(batch_tile, _round_up(B, 8))
    sub_rows = max(8, (min(sub_tile, tb_target) // 8) * 8)
    tb = _round_up(tb_target, sub_rows)

    # Cap the DMA tile so the double-buffered x block stays within ~32 MiB of
    # VMEM (safe on v7x's 64 MiB as well as v5e/v6e's 128 MiB).
    row_bytes = _round_up(in_features, 128) * x.dtype.itemsize   # lane-padded row
    max_tb = max(sub_rows, ((32 << 20) // (2 * row_bytes)) // sub_rows * sub_rows)
    tb = min(tb, max_tb)
    n_sub = tb // sub_rows

    steps_total = pl.cdiv(B, tb)

    # ---- megacore split: v7x has 2 TensorCores, v5e/v6e have 1 ---------------
    if num_partials is None:
        try:
            kind = jax.devices()[0].device_kind.lower()
        except Exception:
            kind = ""
        num_partials = 2 if (("v7" in kind or "7x" in kind) and steps_total >= 2) else 1
    num_partials = max(1, min(num_partials, steps_total))
    spp = pl.cdiv(steps_total, num_partials)      # batch tiles per partial

    # Pre-split W2 so the kernel never materializes the lane concat [x1 | x2].
    w2a = w2[:out_features, :]
    w2b = w2[out_features:, :]

    kernel = functools.partial(
        simple_linear_kernel,
        total_rows=B, steps_per_partial=spp, sub_rows=sub_rows, n_sub=n_sub)

    last_block = steps_total - 1

    def x_index_map(c, i):
        # Clamp so overhang steps (num_partials * spp > steps_total) re-read a
        # valid tile; the kernel's row mask zeroes all of their contributions.
        return (jnp.minimum(c * spp + i, last_block), 0)

    grid_spec = pltpu.PrefetchScalarGridSpec(
        num_scalar_prefetch=0,
        grid=(num_partials, spp),
        in_specs=[
            pl.BlockSpec((tb, in_features), x_index_map),                   # x (tiled)
            pl.BlockSpec((in_features, out_features), lambda c, i: (0, 0)), # w1
            pl.BlockSpec((1, out_features), lambda c, i: (0, 0)),           # b1
            pl.BlockSpec((out_features, 5), lambda c, i: (0, 0)),           # w2[:OUT]
            pl.BlockSpec((out_features, 5), lambda c, i: (0, 0)),           # w2[OUT:]
            pl.BlockSpec((1, 5), lambda c, i: (0, 0)),                      # b2
        ],
        # One (IN, 5) partial accumulator per TensorCore, resident across i.
        out_specs=pl.BlockSpec((None, in_features, 5), lambda c, i: (c, 0, 0)),
    )

    # x double buffer + a few MiB of intermediates/weights; never exceeds 44 MiB.
    vmem_limit = int(min(max(2 * tb * row_bytes + (12 << 20), 32 << 20), 44 << 20))

    partials = pl.pallas_call(
        kernel,
        out_shape=jax.ShapeDtypeStruct((num_partials, in_features, 5), jnp.float32),
        grid_spec=grid_spec,
        compiler_params=pltpu.CompilerParams(
            dimension_semantics=("parallel", "arbitrary"),
            vmem_limit_bytes=vmem_limit),
    )(x, w1, b1, w2a, w2b, b2)

    out_half = partials[0] if num_partials == 1 else jnp.sum(partials, axis=0)
    # x3.repeat(1, 2)  =>  x.T @ x3 is just the (IN, 5) half duplicated.
    return jnp.tile(out_half, (1, 2))                                    # (IN, 10)


def init_params(key, in_features, out_features):
    """Deterministic init mimicking nn.Linear's uniform(-1/sqrt(fan_in), +)."""
    k1, k2, k3, k4 = jax.random.split(key, 4)
    bound1 = 1.0 / math.sqrt(in_features)
    w1 = jax.random.uniform(k1, (in_features, out_features), jnp.float32,
                            minval=-bound1, maxval=bound1)
    b1 = jax.random.uniform(k2, (1, out_features), jnp.float32,
                            minval=-bound1, maxval=bound1)
    bound2 = 1.0 / math.sqrt(2 * out_features)
    w2 = jax.random.uniform(k3, (2 * out_features, 5), jnp.float32,
                            minval=-bound2, maxval=bound2)
    b2 = jax.random.uniform(k4, (1, 5), jnp.float32,
                            minval=-bound2, maxval=bound2)
    return w1, b1, w2, b2


def reference_forward(x, w1, b1, w2, b2):
    x1 = x @ w1 + b1
    x2 = jnp.maximum(x1, 0.0)
    cat = jnp.concatenate([x1, x2], axis=1)
    x3 = cat @ w2 + b2
    x3 = jnp.tile(x3, (1, 2))
    return x.T @ x3


if __name__ == "__main__":
    IN_FEATURES, OUT_FEATURES = 32, 16

    key = jax.random.PRNGKey(0)
    kx, kp, kx2 = jax.random.split(key, 3)
    w1, b1, w2, b2 = init_params(kp, IN_FEATURES, OUT_FEATURES)

    # Case 1: small batch, single grid step, single sub-chunk.
    B = 8
    x = jax.random.normal(kx, (B, IN_FEATURES), jnp.float32)
    out = jax.block_until_ready(simple_linear_forward(x, w1, b1, w2, b2))
    ref = reference_forward(x, w1, b1, w2, b2)
    assert out.shape == (IN_FEATURES, 10), out.shape
    assert jnp.allclose(out, ref, atol=1e-4, rtol=1e-4), "mismatch vs reference (B=8)"

    # Case 2: multi-step grid + in-kernel sub-chunking + ragged last-tile masking
    # (200 rows, 128-row DMA tiles, 32-row compute chunks; no wrapper padding).
    B2 = 200
    x2 = jax.random.normal(kx2, (B2, IN_FEATURES), jnp.float32)
    out2 = jax.block_until_ready(
        simple_linear_forward(x2, w1, b1, w2, b2, batch_tile=128, sub_tile=32))
    ref2 = reference_forward(x2, w1, b1, w2, b2)
    assert out2.shape == (IN_FEATURES, 10), out2.shape
    assert jnp.allclose(out2, ref2, atol=1e-3, rtol=1e-4), "mismatch vs reference (B=200, tiled)"

    # Case 3: default (large-tile) configuration on the same data.
    out3 = jax.block_until_ready(simple_linear_forward(x2, w1, b1, w2, b2))
    assert jnp.allclose(out3, ref2, atol=1e-3, rtol=1e-4), "mismatch vs reference (B=200, default)"

    print("KERNEL_OK")
</pallas_src>

<mosaic_0001>
module attributes {stable_mosaic.version = 11 : i64} {
  func.func @simple_linear_kernel(%arg0: i32, %arg1: i32, %arg2: memref<8x32xf32, #tpu.memory_space<vmem>>, %arg3: memref<32x16xf32, #tpu.memory_space<vmem>>, %arg4: memref<1x16xf32, #tpu.memory_space<vmem>>, %arg5: memref<16x5xf32, #tpu.memory_space<vmem>>, %arg6: memref<16x5xf32, #tpu.memory_space<vmem>>, %arg7: memref<1x5xf32, #tpu.memory_space<vmem>>, %arg8: memref<1x32x5xf32, #tpu.memory_space<vmem>>) attributes {dimension_semantics = [#tpu.dimension_semantics<parallel>, #tpu.dimension_semantics<arbitrary>], iteration_bounds = array<i64: 1, 1>, scalar_prefetch = 0 : i64, scratch_operands = 0 : i64, tpu.core_type = #tpu.core_type<tc>, window_params = [{transform_indices = @transform_0, window_bounds = array<i64: 8, 32>}, {pipeline_mode = #tpu.pipeline_mode<synchronous>, transform_indices = @transform_1, window_bounds = array<i64: 32, 16>}, {pipeline_mode = #tpu.pipeline_mode<synchronous>, transform_indices = @transform_2, window_bounds = array<i64: 1, 16>}, {pipeline_mode = #tpu.pipeline_mode<synchronous>, transform_indices = @transform_3, window_bounds = array<i64: 16, 5>}, {pipeline_mode = #tpu.pipeline_mode<synchronous>, transform_indices = @transform_4, window_bounds = array<i64: 16, 5>}, {pipeline_mode = #tpu.pipeline_mode<synchronous>, transform_indices = @transform_5, window_bounds = array<i64: 1, 5>}, {transform_indices = @transform_6, window_bounds = array<i64: 1, 32, 5>}]} {
    %c0_i32 = arith.constant 0 : i32
    %0 = arith.cmpi eq, %arg1, %c0_i32 : i32
    %1 = arith.extui %0 : i1 to i32
    %c0_i32_0 = arith.constant 0 : i32
    %2 = arith.cmpi ne, %1, %c0_i32_0 : i32
    scf.if %2 {
      %cst_27 = arith.constant 0.000000e+00 : f32
      %44 = vector.broadcast %cst_27 : f32 to vector<32x5xf32>
      %c0_28 = arith.constant 0 : index
      %c0_29 = arith.constant 0 : index
      %c0_30 = arith.constant 0 : index
      %45 = vector.load %arg8[%c0_28, %c0_29, %c0_30] : memref<1x32x5xf32, #tpu.memory_space<vmem>>, vector<1x32x5xf32>
      %46 = vector.shape_cast %45 : vector<1x32x5xf32> to vector<32x5xf32>
      %47 = vector.shape_cast %44 : vector<32x5xf32> to vector<1x32x5xf32>
      tpu.vector_store %arg8[%c0_28, %c0_29, %c0_30], %47 {strides = array<i32>} : memref<1x32x5xf32, #tpu.memory_space<vmem>>, vector<1x32x5xf32>,
    } else {
    }
    %c1_i32 = arith.constant 1 : i32
    %3 = arith.muli %arg0, %c1_i32 : i32
    %4 = arith.addi %3, %arg1 : i32
    %c8_i32 = arith.constant 8 : i32
    %5 = arith.muli %4, %c8_i32 : i32
    %c0 = arith.constant 0 : index
    %c0_1 = arith.constant 0 : index
    %6 = vector.load %arg3[%c0, %c0_1] : memref<32x16xf32, #tpu.memory_space<vmem>>, vector<32x16xf32>
    %c0_2 = arith.constant 0 : index
    %c0_3 = arith.constant 0 : index
    %7 = vector.load %arg4[%c0_2, %c0_3] : memref<1x16xf32, #tpu.memory_space<vmem>>, vector<1x16xf32>
    %c0_4 = arith.constant 0 : index
    %c0_5 = arith.constant 0 : index
    %8 = vector.load %arg5[%c0_4, %c0_5] : memref<16x5xf32, #tpu.memory_space<vmem>>, vector<16x5xf32>
    %c0_6 = arith.constant 0 : index
    %c0_7 = arith.constant 0 : index
    %9 = vector.load %arg6[%c0_6, %c0_7] : memref<16x5xf32, #tpu.memory_space<vmem>>, vector<16x5xf32>
    %c0_8 = arith.constant 0 : index
    %c0_9 = arith.constant 0 : index
    %10 = vector.load %arg7[%c0_8, %c0_9] : memref<1x5xf32, #tpu.memory_space<vmem>>, vector<1x5xf32>
    %cst = arith.constant 0.000000e+00 : f32
    %11 = vector.broadcast %cst : f32 to vector<32x5xf32>
    %c0_i32_10 = arith.constant 0 : i32
    %c8_i32_11 = arith.constant 8 : i32
    %12 = arith.muli %c0_i32_10, %c8_i32_11 : i32
    %13 = tpu.assume_multiple %12, 8 : i32
    %14 = arith.index_cast %13 : i32 to index
    %c0_12 = arith.constant 0 : index
    %15 = vector.load %arg2[%14, %c0_12] : memref<8x32xf32, #tpu.memory_space<vmem>>, vector<8x32xf32>
    %16 = arith.addi %5, %13 : i32
    %17 = tpu.iota {dimensions = array<i32: 0>} : vector<8x1xi32>
    %18 = vector.broadcast %16 : i32 to vector<8x1xi32>
    %19 = arith.addi %18, %17 : vector<8x1xi32>
    %c8_i32_13 = arith.constant 8 : i32
    %20 = vector.broadcast %c8_i32_13 : i32 to vector<8x1xi32>
    %21 = arith.cmpi slt, %19, %20 : vector<8x1xi32>
    %cst_14 = arith.constant 0.000000e+00 : f32
    %22 = vector.shape_cast %21 : vector<8x1xi1> to vector<8x1xi1>
    %23 = vector.broadcast %22 : vector<8x1xi1> to vector<8x32xi1>
    %24 = vector.broadcast %cst_14 : f32 to vector<8x32xf32>
    %25 = arith.select %23, %15, %24 : vector<8x32xi1>, vector<8x32xf32>
    %cst_15 = arith.constant dense<0.000000e+00> : vector<8x16xf32>
    %26 = tpu.matmul %25, %6, %cst_15 {dimension_numbers = #tpu.dot_dimension_numbers<[1], [0], [0], [1], [0, 0, 1, 1], [], []>} : vector<8x32xf32>, vector<32x16xf32>, vector<8x16xf32> -> vector<8x16xf32>
    %27 = vector.broadcast %7 : vector<1x16xf32> to vector<8x16xf32>
    %28 = arith.addf %26, %27 : vector<8x16xf32>
    %cst_16 = arith.constant 0.000000e+00 : f32
    %29 = vector.broadcast %cst_16 : f32 to vector<8x16xf32>
    %30 = arith.maximumf %28, %29 : vector<8x16xf32>
    %cst_17 = arith.constant dense<0.000000e+00> : vector<8x5xf32>
    %31 = tpu.matmul %28, %8, %cst_17 {dimension_numbers = #tpu.dot_dimension_numbers<[1], [0], [0], [1], [0, 0, 1, 1], [], []>} : vector<8x16xf32>, vector<16x5xf32>, vector<8x5xf32> -> vector<8x5xf32>
    %cst_18 = arith.constant dense<0.000000e+00> : vector<8x5xf32>
    %32 = tpu.matmul %30, %9, %cst_18 {dimension_numbers = #tpu.dot_dimension_numbers<[1], [0], [0], [1], [0, 0, 1, 1], [], []>} : vector<8x16xf32>, vector<16x5xf32>, vector<8x5xf32> -> vector<8x5xf32>
    %33 = arith.addf %31, %32 : vector<8x5xf32>
    %34 = vector.broadcast %10 : vector<1x5xf32> to vector<8x5xf32>
    %35 = arith.addf %33, %34 : vector<8x5xf32>
    %cst_19 = arith.constant dense<0.000000e+00> : vector<32x5xf32>
    %36 = tpu.matmul %25, %35, %cst_19 {dimension_numbers = #tpu.dot_dimension_numbers<[0], [0], [1], [1], [0, 1, 1, 1], [], []>} : vector<8x32xf32>, vector<8x5xf32>, vector<32x5xf32> -> vector<32x5xf32>
    %37 = arith.addf %11, %36 : vector<32x5xf32>
    %c1_i32_20 = arith.constant 1 : i32
    %c0_21 = arith.constant 0 : index
    %c0_22 = arith.constant 0 : index
    %c0_23 = arith.constant 0 : index
    %38 = vector.load %arg8[%c0_21, %c0_22, %c0_23] : memref<1x32x5xf32, #tpu.memory_space<vmem>>, vector<1x32x5xf32>
    %39 = vector.shape_cast %38 : vector<1x32x5xf32> to vector<32x5xf32>
    %40 = arith.addf %39, %37 : vector<32x5xf32>
    %c0_24 = arith.constant 0 : index
    %c0_25 = arith.constant 0 : index
    %c0_26 = arith.constant 0 : index
    %41 = vector.load %arg8[%c0_24, %c0_25, %c0_26] : memref<1x32x5xf32, #tpu.memory_space<vmem>>, vector<1x32x5xf32>
    %42 = vector.shape_cast %41 : vector<1x32x5xf32> to vector<32x5xf32>
    %43 = vector.shape_cast %40 : vector<32x5xf32> to vector<1x32x5xf32>
    tpu.vector_store %arg8[%c0_24, %c0_25, %c0_26], %43 {strides = array<i32>} : memref<1x32x5xf32, #tpu.memory_space<vmem>>, vector<1x32x5xf32>,
    return
  }
  func.func @transform_0(%arg0: i32, %arg1: i32) -> (i32, i32) {
    %c1_i32 = arith.constant 1 : i32
    %0 = arith.muli %arg0, %c1_i32 : i32
    %1 = arith.addi %0, %arg1 : i32
    %c0_i32 = arith.constant 0 : i32
    %2 = arith.minsi %1, %c0_i32 : i32
    %c0_i32_0 = arith.constant 0 : i32
    %c0_i32_1 = arith.constant 0 : i32
    return %2, %c0_i32_0 : i32, i32
  }
  func.func @transform_1(%arg0: i32, %arg1: i32) -> (i32, i32) {
    %c0_i32 = arith.constant 0 : i32
    %c0_i32_0 = arith.constant 0 : i32
    %c0_i32_1 = arith.constant 0 : i32
    return %c0_i32, %c0_i32_0 : i32, i32
  }
  func.func @transform_2(%arg0: i32, %arg1: i32) -> (i32, i32) {
    %c0_i32 = arith.constant 0 : i32
    %c0_i32_0 = arith.constant 0 : i32
    %c0_i32_1 = arith.constant 0 : i32
    return %c0_i32, %c0_i32_0 : i32, i32
  }
  func.func @transform_3(%arg0: i32, %arg1: i32) -> (i32, i32) {
    %c0_i32 = arith.constant 0 : i32
    %c0_i32_0 = arith.constant 0 : i32
    %c0_i32_1 = arith.constant 0 : i32
    return %c0_i32, %c0_i32_0 : i32, i32
  }
  func.func @transform_4(%arg0: i32, %arg1: i32) -> (i32, i32) {
    %c0_i32 = arith.constant 0 : i32
    %c0_i32_0 = arith.constant 0 : i32
    %c0_i32_1 = arith.constant 0 : i32
    return %c0_i32, %c0_i32_0 : i32, i32
  }
  func.func @transform_5(%arg0: i32, %arg1: i32) -> (i32, i32) {
    %c0_i32 = arith.constant 0 : i32
    %c0_i32_0 = arith.constant 0 : i32
    %c0_i32_1 = arith.constant 0 : i32
    return %c0_i32, %c0_i32_0 : i32, i32
  }
  func.func @transform_6(%arg0: i32, %arg1: i32) -> (i32, i32, i32) {
    %c0_i32 = arith.constant 0 : i32
    %c0_i32_0 = arith.constant 0 : i32
    %c0_i32_1 = arith.constant 0 : i32
    return %arg0, %c0_i32, %c0_i32_0 : i32, i32, i32
  }
}

</mosaic_0001>

<bundles_post_ra>
// kernel: tpu_custom_call.1
= control target key start
LH: loop header
LB: loop body
LE: loop exit
PB: predicated region body
PF: predicated region fallthrough
CT: control target
= control target key end

     0   :  { %v531_v0 = vmov 0.0   ;;  %vm532_vm0 = vmmov 0   ;;  %vm87_vm1 = vcmask 261120   ;;  %vm162_vm2 = vcmask 130048   ;;  %s652_s1 = inlined_call_operand.vmem [shape: f32[32,16], index: 1, kind: input, shape index: {}]   ;;  %s653_s0 = inlined_call_operand.vmem [shape: f32[8,32], index: 0, kind: input, shape index: {}]   ;;  %s654_s4 = inlined_call_operand.vmem [shape: f32[16,5], index: 4, kind: input, shape index: {}]   ;;  %s655_s2 = inlined_call_operand.vmem [shape: f32[1,16], index: 2, kind: input, shape index: {}]   ;;  %s656_s3 = inlined_call_operand.vmem [shape: f32[16,5], index: 3, kind: input, shape index: {}]   ;;  %s657_s6 = inlined_call_operand.vmem [shape: f32[1,32,5], index: 6, kind: output, shape index: {}]   ;;  %s658_s5 = inlined_call_operand.vmem [shape: f32[1,5], index: 5, kind: input, shape index: {}]  }
   0x1   :  { %494 = vmatprep.subr.mxu0 %v531_v0  ;;  %v64_v1 = vld [vmem:[%s652_s1 + $0x18] sm:$0xff]  ;;  %v63_v2 = vld [vmem:[%s652_s1 + $0x10] sm:$0xff]  ;;  %502 = vmatprep.mubr.msk.f32.mxu0 %vm532_vm0, %v531_v0  ;;  %v62_v3 = vld [vmem:[%s652_s1 + $0x8] sm:$0xff]  ;;  %vm348_vm3 = vcmask 64512   ;;  %vm54_vm4 = vcmask 39936  }
   0x2   :  { %495 = vmatpush3.msra.mxu0 %v64_v1  ;;  %505 = vmatprep.subr.mxu1 %v531_v0  ;;  %v71_v4 = vld [vmem:[%s653_s0] sm:$0xff]  ;;  %v69_v6 = vld [vmem:[%s654_s4 + $0x8] sm:$0xff]  ;;  %56 = vst.msk [vmem:[%s657_s6 + $0x8] sm:$0xff] %vm54_vm4, %v531_v0  ;;  %55 = vst.msk [vmem:[%s657_s6] sm:$0xff] %vm54_vm4, %v531_v0 }
   0x3   :  { %496 = vmatprep.subr.mxu0 %v531_v0  ;;  %509 = vmatprep.mubr.msk.f32.mxu1 %vm532_vm0, %v531_v0  ;;  %v61_v5 = vld [vmem:[%s652_s1] sm:$0xff]  ;;  %v67_v13 = vld [vmem:[%s656_s3 + $0x8] sm:$0xff]  ;;  %57 = vst.msk [vmem:[%s657_s6 + $0x10] sm:$0xff] %vm54_vm4, %v531_v0  ;;  %58 = vst.msk [vmem:[%s657_s6 + $0x18] sm:$0xff] %vm54_vm4, %v531_v0 }
   0x4   :  { %497 = vmatpush3.msra.mxu0 %v63_v2  ;;  %316 = vxpose.xlu0.b32.start.end [1/1] (short) (narrow) %v71_v4, 32  ;;  %v68_v7 = vld [vmem:[%s654_s4] sm:$0xff] }
   0x5   :  { %498 = vmatprep.subr.mxu0 %v531_v0  ;;  %506 = vmatpush3.msra.mxu1 %v69_v6  ;;  %v469_v8 = vld [vmem:[%s655_s2] ss:$0 sm:$0xff] }
   0x6   :  { %499 = vmatpush3.msra.mxu0 %v62_v3  ;;  %507 = vmatprep.subr.mxu1 %v531_v0  ;;  %v66_v14 = vld [vmem:[%s656_s3] sm:$0xff] }
   0x7   :  { %500 = vmatprep.subr.mxu0 %v531_v0  ;;  %508 = vmatpush3.msra.mxu1 %v68_v7  ;;  %v473_v20 = vld [vmem:[%s658_s5] ss:$0 sm:$0xff] }
   0x8   :  { %501 = vmatpush3.msra.mxu0 %v61_v5  ;;  %512 = vmatprep.subr.mxu1 %v531_v0 }
   0x9   :  { %503 = vmatmul.mubr.msk.f32.vlgmr.msra.gmra.mxu0 %vm87_vm1, %v71_v4  ;;  %v447_v26 = vld [vmem:[%s657_s6 + $0x8] sm:$0xff]  ;;  %v446_v30 = vld [vmem:[%s657_s6] sm:$0xff] }
   0xa   :  { %v449_v27 = vld [vmem:[%s657_s6 + $0x18] sm:$0xff]  ;;  %v448_v31 = vld [vmem:[%s657_s6 + $0x10] sm:$0xff] }
  0x80   :  { %v332_v15 = vpop.trf.xlu0 }
  0x81   :  { %521 = vmatprep.mubr.msk.f32.mxu0 %vm348_vm3, %v332_v15 }
  0x84   :  { %v333_v16 = vpop.trf.xlu0 }
  0x88   :  { %v334_v17 = vpop.trf.xlu0 }
  0x8c   :  { %v335_v25 = vpop.trf.xlu0 }
  0xc9   :  { %v157_v9 = vpop.f32.mrf.mxu0 }
  0xca   :  { %v158_v10 = vadd.f32 %v469_v8, %v157_v9 }
  0xcb   :  { %v504_v11 = vpop.f32.mrf.mxu0 }
  0xcc   :  { %v161_v12 = vmax.f32 %v158_v10, 0.0 }
  0xce   :  { %510 = vmatmul.mubr.msk.f32.vlgmr.msra.gmra.mxu1 %vm162_vm2, %v161_v12 }
  0xcf   :  { %513 = vmatpush3.msra.mxu1 %v67_v13  ;;  %516 = vmatprep.mubr.msk.f32.mxu1 %vm532_vm0, %v531_v0 }
  0xd0   :  { %514 = vmatprep.subr.mxu1 %v531_v0 }
  0xd1   :  { %515 = vmatpush3.msra.mxu1 %v66_v14 }
  0xd2   :  { %517 = vmatmul.mubr.msk.f32.vlgmr.msra.gmra.mxu1 %vm162_vm2, %v158_v10 }
  0xd3   :  { %524 = vmatprep.mubr.msk.f32.mxu1 %vm348_vm3, %v334_v17 }
 0x18e   :  { %v232_v18 = vpop.f32.mrf.mxu1 }
 0x190   :  { %v511_v19 = vpop.f32.mrf.mxu1 }
 0x192   :  { %v305_v21 = vpop.f32.mrf.mxu1 }
 0x193   :  { %v306_v22 = vadd.f32 %v305_v21, %v232_v18 }
 0x194   :  { %v518_v23 = vpop.f32.mrf.mxu1 }
 0x195   :  { %v315_v24 = vadd.f32 %v473_v20, %v306_v22 }
 0x197   :  { %519 = vmatprep.subr.mxu0 %v315_v24  ;;  %527 = vmatprep.subr.mxu1 %v315_v24 }
 0x198   :  { %520 = vmatpush3.msra.mxu0 %v315_v24  ;;  %528 = vmatpush3.msra.mxu1 %v315_v24 }
 0x199   :  { %522 = vmatmul.mubr.msk.f32.vlgmr.msra.gmra.mxu0 %vm348_vm3, %v333_v16  ;;  %525 = vmatmul.mubr.msk.f32.vlgmr.msra.gmra.mxu1 %vm348_vm3, %v335_v25 }
 0x259   :  { %v523_v28 = vpop.f32.mrf.mxu0  ;;  %v526_v29 = vpop.f32.mrf.mxu1 }
 0x25a   :  { %v451_v32 = vadd.f32 %v523_v28, %v447_v26  ;;  %v453_v33 = vadd.f32 %v526_v29, %v449_v27 }
 0x25b   :  { %v427_v34 = vpop.f32.mrf.mxu0  ;;  %v437_v35 = vpop.f32.mrf.mxu1 }
 0x25c   :  { %456 = vst.msk [vmem:[%s657_s6 + $0x8] sm:$0xff] %vm54_vm4, %v451_v32  ;;  %458 = vst.msk [vmem:[%s657_s6 + $0x18] sm:$0xff] %vm54_vm4, %v453_v33  ;;  %v450_v36 = vadd.f32 %v446_v30, %v427_v34  ;;  %v452_v37 = vadd.f32 %v448_v31, %v437_v35 }
 0x25e   :  { %455 = vst.msk [vmem:[%s657_s6] sm:$0xff] %vm54_vm4, %v450_v36  ;;  %457 = vst.msk [vmem:[%s657_s6 + $0x10] sm:$0xff] %vm54_vm4, %v452_v37 }

</bundles_post_ra>
